<compile_context>
chip_gen: v7x
topology: tpu7x:2x2x1
jax: 0.10.0
libtpu: 0.0.40
codegen_flags: <defaults>
</compile_context>

<pallas_src>
import functools

import jax
import jax.numpy as jnp
from jax.experimental import pallas as pl
from jax.experimental.pallas import tpu as pltpu

_LANES = 128
_MAX_TILE_ROWS = 512  # 512 x 128 f32 = 256 KiB per block (x2 buffers x in+out ~ 1 MiB)


def _legendre_bias_kernel(x_ref, w_ref, out_ref, *, degree, center, inv_half):
    """Elementwise hot path on one (tile_rows, 128) tile.

    x_ref   : VMEM (tile_rows, 128) float32 -- selected coordinate, packed lane-dense
    w_ref   : SMEM (degree,) float32        -- Legendre coefficients (scalar reads)
    out_ref : VMEM (tile_rows, 128) float32 -- bias per particle
    """
    # Normalize to [-1, 1]; division folded at trace time into a multiply.
    x = (x_ref[...] - center) * inv_half

    # bias = w0*P0 + w1*P1 + ...  with P_0 = 1, P_1 = x folded directly (no
    # ones_like / zeros_like full-tile ops).
    if degree >= 2:
        bias = w_ref[0] + w_ref[1] * x
    else:
        bias = w_ref[0] + jnp.zeros_like(x)

    # Bonnet recursion, unrolled at trace time (degree is static):
    #   P_{n+1}(x) = a_n * x * P_n(x) - b_n * P_{n-1}(x)
    # with trace-time constants a_n = (2n+1)/(n+1), b_n = n/(n+1).
    p_nm1 = None  # P_0 == 1, folded as a scalar into the n == 1 step
    p_n = x
    for n in range(1, degree - 1):
        a_n = (2.0 * n + 1.0) / (n + 1.0)
        b_n = float(n) / (n + 1.0)
        if n == 1:
            p_np1 = a_n * x * p_n - b_n
        else:
            p_np1 = a_n * x * p_n - b_n * p_nm1
        p_nm1 = p_n
        p_n = p_np1
        bias = bias + w_ref[n + 1] * p_n

    out_ref[...] = bias


def legendre_bias_1d(positions, weights, xmin, xmax, axis='x'):
    """positions: (N, 3) float32; weights: (degree,) -> bias (N,) float32."""
    if axis == 'x':
        axis_idx = 0
    elif axis == 'y':
        axis_idx = 1
    else:
        raise ValueError('Invalid axis')

    degree = int(weights.shape[0])
    n = positions.shape[0]
    if degree == 0:
        return jnp.zeros((n,), dtype=positions.dtype)

    weights = jnp.asarray(weights, dtype=positions.dtype)

    # Only the selected column goes to the kernel (4N bytes, not 12N). This
    # slice stays outside the kernel so XLA can fuse it with upstream producers.
    x_col = positions[:, axis_idx]

    # Pack into full-vreg (rows, 128) tiles; rows padded to a multiple of 8
    # sublanes, then to a multiple of the tile height so every block is full.
    rows = pl.cdiv(n, _LANES)
    rows_min = ((rows + 7) // 8) * 8
    tile_rows = min(_MAX_TILE_ROWS, rows_min)
    rows_padded = pl.cdiv(rows_min, tile_rows) * tile_rows
    n_padded = rows_padded * _LANES
    x2d = jnp.pad(x_col, (0, n_padded - n)).reshape(rows_padded, _LANES)

    # Static normalization constants (xmax == xmin raises at trace time, same
    # divide-by-zero semantics as the reference module).
    center = (float(xmin) + float(xmax)) * 0.5
    inv_half = 1.0 / ((float(xmax) - float(xmin)) * 0.5)

    kernel = functools.partial(
        _legendre_bias_kernel,
        degree=degree,
        center=center,
        inv_half=inv_half,
    )

    out = pl.pallas_call(
        kernel,
        out_shape=jax.ShapeDtypeStruct((rows_padded, _LANES), positions.dtype),
        grid=(rows_padded // tile_rows,),
        in_specs=[
            pl.BlockSpec((tile_rows, _LANES), lambda i: (i, 0)),      # x tiles (VMEM)
            pl.BlockSpec(memory_space=pltpu.MemorySpace.SMEM),        # weights (SMEM)
        ],
        out_specs=pl.BlockSpec((tile_rows, _LANES), lambda i: (i, 0)),
        compiler_params=pltpu.CompilerParams(
            dimension_semantics=("parallel",)),
    )(x2d, weights)

    return out.reshape(n_padded)[:n]


def _legendre_bias_ref(positions, weights, xmin, xmax, axis='x'):
    """Pure-JAX reference mirroring the PyTorch module (for verification)."""
    axis_idx = 0 if axis == 'x' else 1
    x = positions[:, axis_idx]
    x = (x - (xmin + xmax) / 2.0) / ((xmax - xmin) / 2.0)
    degree = int(weights.shape[0])
    bias = jnp.zeros_like(x)
    p_nm1 = jnp.ones_like(x)
    p_n = x
    for i in range(degree):
        if i == 0:
            p_i = jnp.ones_like(x)
        elif i == 1:
            p_i = x
        else:
            m = i - 1
            p_np1 = ((2 * m + 1) * x * p_n - m * p_nm1) / (m + 1)
            p_nm1 = p_n
            p_n = p_np1
            p_i = p_n
        bias = bias + weights[i] * p_i
    return bias


if __name__ == "__main__":
    key = jax.random.PRNGKey(0)
    k1, k2 = jax.random.split(key)

    xmin, xmax = -1.0, 2.0

    # Case 1: tiny problem matching the module's intent (8 particles, 3 dims).
    N1, deg1 = 8, 5
    pos1 = jax.random.uniform(k1, (N1, 3), dtype=jnp.float32, minval=xmin, maxval=xmax)
    w1 = (0.1 * jnp.arange(1, deg1 + 1, dtype=jnp.float32)) * jnp.array(
        [1.0, -1.0, 1.0, -1.0, 1.0], dtype=jnp.float32)

    bias1 = jax.block_until_ready(legendre_bias_1d(pos1, w1, xmin, xmax, axis='x'))
    ref1 = _legendre_bias_ref(pos1, w1, xmin, xmax, axis='x')
    assert bias1.shape == (N1,)
    assert jnp.allclose(bias1, ref1, atol=1e-5, rtol=1e-5), (bias1, ref1)

    # Case 2: non-multiple-of-128 particle count + 'y' axis (exercises padding).
    N2, deg2 = 300, 6
    pos2 = jax.random.uniform(k2, (N2, 3), dtype=jnp.float32, minval=xmin, maxval=xmax)
    w2 = 0.05 * jnp.arange(1, deg2 + 1, dtype=jnp.float32)

    bias2 = jax.block_until_ready(legendre_bias_1d(pos2, w2, xmin, xmax, axis='y'))
    ref2 = _legendre_bias_ref(pos2, w2, xmin, xmax, axis='y')
    assert bias2.shape == (N2,)
    assert jnp.allclose(bias2, ref2, atol=1e-5, rtol=1e-5), (bias2, ref2)

    print("KERNEL_OK")
</pallas_src>

<mosaic_0001>
module attributes {stable_mosaic.version = 11 : i64} {
  func.func @_legendre_bias_kernel(%arg0: i32, %arg1: memref<8x128xf32, #tpu.memory_space<vmem>>, %arg2: memref<5xf32, #tpu.memory_space<smem>>, %arg3: memref<8x128xf32, #tpu.memory_space<vmem>>) attributes {dimension_semantics = [#tpu.dimension_semantics<parallel>], iteration_bounds = array<i64: 1>, scalar_prefetch = 0 : i64, scratch_operands = 0 : i64, tpu.core_type = #tpu.core_type<tc>, window_params = [{transform_indices = @transform_0, window_bounds = array<i64: 8, 128>}, {transform_indices = @transform_1, window_bounds = array<i64: 5>}, {transform_indices = @transform_2, window_bounds = array<i64: 8, 128>}]} {
    %c0 = arith.constant 0 : index
    %c0_0 = arith.constant 0 : index
    %0 = vector.load %arg1[%c0, %c0_0] : memref<8x128xf32, #tpu.memory_space<vmem>>, vector<8x128xf32>
    %cst = arith.constant 5.000000e-01 : f32
    %1 = vector.broadcast %cst : f32 to vector<8x128xf32>
    %2 = arith.subf %0, %1 : vector<8x128xf32>
    %cst_1 = arith.constant 0.666666686 : f32
    %3 = vector.broadcast %cst_1 : f32 to vector<8x128xf32>
    %4 = arith.mulf %2, %3 : vector<8x128xf32>
    %c0_2 = arith.constant 0 : index
    %5 = memref.load %arg2[%c0_2] : memref<5xf32, #tpu.memory_space<smem>>
    %c1 = arith.constant 1 : index
    %6 = memref.load %arg2[%c1] : memref<5xf32, #tpu.memory_space<smem>>
    %7 = vector.broadcast %6 : f32 to vector<8x128xf32>
    %8 = arith.mulf %7, %4 : vector<8x128xf32>
    %9 = vector.broadcast %5 : f32 to vector<8x128xf32>
    %10 = arith.addf %9, %8 : vector<8x128xf32>
    %cst_3 = arith.constant 1.500000e+00 : f32
    %11 = vector.broadcast %cst_3 : f32 to vector<8x128xf32>
    %12 = arith.mulf %11, %4 : vector<8x128xf32>
    %13 = arith.mulf %12, %4 : vector<8x128xf32>
    %cst_4 = arith.constant 5.000000e-01 : f32
    %14 = vector.broadcast %cst_4 : f32 to vector<8x128xf32>
    %15 = arith.subf %13, %14 : vector<8x128xf32>
    %c2 = arith.constant 2 : index
    %16 = memref.load %arg2[%c2] : memref<5xf32, #tpu.memory_space<smem>>
    %17 = vector.broadcast %16 : f32 to vector<8x128xf32>
    %18 = arith.mulf %17, %15 : vector<8x128xf32>
    %19 = arith.addf %10, %18 : vector<8x128xf32>
    %cst_5 = arith.constant 1.66666663 : f32
    %20 = vector.broadcast %cst_5 : f32 to vector<8x128xf32>
    %21 = arith.mulf %20, %4 : vector<8x128xf32>
    %22 = arith.mulf %21, %15 : vector<8x128xf32>
    %cst_6 = arith.constant 0.666666686 : f32
    %23 = vector.broadcast %cst_6 : f32 to vector<8x128xf32>
    %24 = arith.mulf %23, %4 : vector<8x128xf32>
    %25 = arith.subf %22, %24 : vector<8x128xf32>
    %c3 = arith.constant 3 : index
    %26 = memref.load %arg2[%c3] : memref<5xf32, #tpu.memory_space<smem>>
    %27 = vector.broadcast %26 : f32 to vector<8x128xf32>
    %28 = arith.mulf %27, %25 : vector<8x128xf32>
    %29 = arith.addf %19, %28 : vector<8x128xf32>
    %cst_7 = arith.constant 1.750000e+00 : f32
    %30 = vector.broadcast %cst_7 : f32 to vector<8x128xf32>
    %31 = arith.mulf %30, %4 : vector<8x128xf32>
    %32 = arith.mulf %31, %25 : vector<8x128xf32>
    %cst_8 = arith.constant 7.500000e-01 : f32
    %33 = vector.broadcast %cst_8 : f32 to vector<8x128xf32>
    %34 = arith.mulf %33, %15 : vector<8x128xf32>
    %35 = arith.subf %32, %34 : vector<8x128xf32>
    %c4 = arith.constant 4 : index
    %36 = memref.load %arg2[%c4] : memref<5xf32, #tpu.memory_space<smem>>
    %37 = vector.broadcast %36 : f32 to vector<8x128xf32>
    %38 = arith.mulf %37, %35 : vector<8x128xf32>
    %39 = arith.addf %29, %38 : vector<8x128xf32>
    %c0_9 = arith.constant 0 : index
    %c0_10 = arith.constant 0 : index
    %40 = vector.load %arg3[%c0_9, %c0_10] : memref<8x128xf32, #tpu.memory_space<vmem>>, vector<8x128xf32>
    tpu.vector_store %arg3[%c0_9, %c0_10], %39 {strides = array<i32>} : memref<8x128xf32, #tpu.memory_space<vmem>>, vector<8x128xf32>,
    return
  }
  func.func @transform_0(%arg0: i32) -> (i32, i32) {
    %c0_i32 = arith.constant 0 : i32
    %c0_i32_0 = arith.constant 0 : i32
    return %arg0, %c0_i32 : i32, i32
  }
  func.func @transform_1(%arg0: i32) -> i32 {
    %c0_i32 = arith.constant 0 : i32
    %c0_i32_0 = arith.constant 0 : i32
    return %c0_i32 : i32
  }
  func.func @transform_2(%arg0: i32) -> (i32, i32) {
    %c0_i32 = arith.constant 0 : i32
    %c0_i32_0 = arith.constant 0 : i32
    return %arg0, %c0_i32 : i32, i32
  }
}

</mosaic_0001>

<bundles_post_ra>
// kernel: tpu_custom_call.1
= control target key start
LH: loop header
LB: loop body
LE: loop exit
PB: predicated region body
PF: predicated region fallthrough
CT: control target
= control target key end

     0   :  { %7 = vsyncpa [#allocation3], 0  ;;  %s202_s0 = inlined_call_operand.hbm [shape: f32[8,128], index: 0, kind: input, shape index: {}]   ;;  %s203_s1 = inlined_call_operand.vmem [shape: f32[5], index: 1, kind: input, shape index: {}]   ;;  %s204_s2 = inlined_call_operand.hbm [shape: f32[8,128], index: 2, kind: output, shape index: {}]  }
   0x1   :  { %8 = vsyncpa [#allocation5], 0 }
   0x2   :  { %9 = vsyncpa [#allocation4], 0  ;;  %s26_s11 = sshll.u32 %s203_s1, 4  ;;  %s157_s12 = smov [#allocation2]   ;;  %s27_s11 = int_to_ptr.vmem [resolvable:$true] %s26_s11 }
   0x3   :  { %s16_s13 = sshll.u32 %s157_s12, 4  ;;  %s95_s16 = scalar_lea.hbm %s202_s0, 128  ;;  %s17_s13 = int_to_ptr.vmem [resolvable:$true] %s16_s13 }
   0x4   :  { %p96_p0 = scmp.ne.s32.totalorder %s202_s0, %s95_s16  ;;  %p99_p1 = scmp.lt.u32.totalorder %s95_s16, %s202_s0 }
   0x6   :  { %p101_p2 = pnand %p99_p1, %p96_p0 }
   0x8   :  { %104 = shalt.err (!%p101_p2)
}
   0x9   :  { %s105_s21 = scalar_lea.vmem %s17_s13, 128  ;;  %p110_p4 = scmp.lt.s32.totalorder %s17_s13, %s17_s13 }
   0xa   :  { %p106_p3 = scmp.ne.s32.totalorder %s17_s13, %s105_s21  ;;  %p111_p5 = scmp.lt.s32.totalorder %s105_s21, %s105_s21 }
   0xc   :  { %p112_p6 = por %p111_p5, %p110_p4 }
   0xe   :  { %p113_p7 = pnand %p112_p6, %p106_p3 }
  0x10   :  { %116 = shalt.err (!%p113_p7)
}
  0x11   :  { %19 = dma.hbm_to_vmem [thread:$0]  %s202_s0, 128, %s17_s13, [#allocation3]  }
  0x12   :  { %s117_s23 = scalar_lea.vmem %s27_s11, 16  ;;  %p122_p9 = scmp.lt.s32.totalorder %s27_s11, %s27_s11 }
  0x13   :  { %p118_p8 = scmp.ne.s32.totalorder %s27_s11, %s117_s23  ;;  %p123_p10 = scmp.lt.s32.totalorder %s117_s23, %s117_s23 }
  0x15   :  { %p124_p11 = por %p123_p10, %p122_p9 }
  0x17   :  { %p125_p12 = pnand %p124_p11, %p118_p8 }
  0x19   :  { %128 = shalt.err (!%p125_p12)
}
  0x1a   :  { %s158_s24 = smov [#allocation6]  }
  0x1b   :  { %29 = dma.vmem_to_smem %s27_s11, 16, %s158_s24, [#allocation5]  }
  0x1c   :  { %151 = dma.done.wait [#allocation3], 128  }
  0x1d   :  { %152 = vsyncadd [#allocation3], 4294967168 }
  0x1e   :  { %153 = dma.done.wait [#allocation5], 16  }
  0x1f   :  { %154 = vsyncadd [#allocation5], 4294967280 }
  0x20   :  { %36 = sfence }
  0x21   :  { %v37_v0 = vld [vmem:[#allocation2] sm:$0xff]  ;;  %s40_s25 = sld [smem:[#allocation6]]  ;;  %s87_s26 = sld [smem:[#allocation6 + $0x1]] }
  0x22   :  { %v86_v1 = vadd.f32 -0.5, %v37_v0  ;;  %s89_s27 = sld [smem:[#allocation6 + $0x2]]  ;;  %s90_s0 = sld [smem:[#allocation6 + $0x3]] }
  0x23   :  { %s91_s28 = sld [smem:[#allocation6 + $0x4]]  ;;  %s159_s29 = smov [#allocation7]  }
  0x24   :  { %v39_v2 = vmul.f32 0.6666667, %v86_v1  ;;  %s76_s30 = sshll.u32 %s159_s29, 4  ;;  %s77_s30 = int_to_ptr.vmem [resolvable:$true] %s76_s30 }
  0x25   :  { %s129_s3 = scalar_lea.vmem %s77_s30, 128  ;;  %p134_p0 = scmp.lt.s32.totalorder %s77_s30, %s77_s30 }
  0x26   :  { %v46_v3 = vmul.f32 1.5, %v39_v2  ;;  %v53_v8 = vmul.f32 1.6666666, %v39_v2  ;;  %v55_v12 = vmul.f32 0.6666667, %v39_v2  ;;  %v61_v15 = vmul.f32 1.75, %v39_v2  ;;  %p130_p13 = scmp.ne.s32.totalorder %s77_s30, %s129_s3  ;;  %p135_p1 = scmp.lt.s32.totalorder %s129_s3, %s129_s3 }
  0x27   :  { %v42_v4 = vstv %s87_s26  ;;  %v44_v5 = vstv %s40_s25 }
  0x28   :  { %v43_v6 = vmul.f32 %v42_v4, %v39_v2  ;;  %v47_v7 = vmul.f32 %v46_v3, %v39_v2  ;;  %v50_v9 = vstv %s89_s27  ;;  %v58_v16 = vstv %s90_s0  ;;  %p136_p2 = por %p135_p1, %p134_p0 }
  0x29   :  { %v66_v22 = vstv %s91_s28 }
  0x2a   :  { %v45_v10 = vadd.f32 %v44_v5, %v43_v6  ;;  %v88_v11 = vadd.f32 -0.5, %v47_v7  ;;  %p137_p3 = pnand %p136_p2, %p130_p13 }
  0x2c   :  { %v51_v13 = vmul.f32 %v88_v11, %v50_v9  ;;  %v54_v14 = vmul.f32 %v88_v11, %v53_v8  ;;  %v63_v19 = vmul.f32 0.75, %v88_v11 }
  0x2e   :  { %v52_v17 = vadd.f32 %v51_v13, %v45_v10  ;;  %v56_v18 = vsub.f32 %v54_v14, %v55_v12 }
  0x30   :  { %v59_v20 = vmul.f32 %v58_v16, %v56_v18  ;;  %v62_v21 = vmul.f32 %v61_v15, %v56_v18 }
  0x32   :  { %v60_v23 = vadd.f32 %v59_v20, %v52_v17  ;;  %v64_v24 = vsub.f32 %v62_v21, %v63_v19 }
  0x34   :  { %v67_v25 = vmul.f32 %v66_v22, %v64_v24 }
  0x36   :  { %v68_v26 = vadd.f32 %v67_v25, %v60_v23 }
  0x38   :  { %69 = vst [vmem:[#allocation7] sm:$0xff] %v68_v26 }
  0x39   :  { %140 = shalt.err (!%p137_p3)
}
  0x3a   :  { %s141_s6 = scalar_lea.hbm %s204_s2, 128 }
  0x3b   :  { %p142_p4 = scmp.ne.s32.totalorder %s204_s2, %s141_s6  ;;  %p145_p5 = scmp.lt.u32.totalorder %s141_s6, %s204_s2 }
  0x3d   :  { %p147_p6 = pnand %p145_p5, %p142_p4 }
  0x3f   :  { %150 = shalt.err (!%p147_p6)
}
  0x40   :  { %79 = dma.vmem_to_hbm [thread:$0]  %s77_s30, 128, %s204_s2, [#allocation4]  }
  0x41   :  { %155 = dma.done.wait [#allocation4], 128  }
  0x42   :  { %156 = vsyncadd [#allocation4], 4294967168 }
  0x43   :  { %83 = vsyncpa [#allocation3], 1 }
  0x44   :  { %84 = vsyncpa [#allocation4], 1 }
  0x45   :  { %85 = vsyncpa [#allocation5], 1 }

</bundles_post_ra>
